<compile_context>
chip_gen: v6e
topology: v6e:2x2x1
jax: 0.10.0
libtpu: 0.0.40
codegen_flags: <defaults>
</compile_context>

<pallas_src>
import jax
import jax.numpy as jnp
from jax.experimental import pallas as pl
from jax.experimental.pallas import tpu as pltpu


def _argmax_channels_kernel(x_ref, o_ref):
    # x_ref block: (TB, C, TL) in native dtype.  Running argmax over C with
    # torch-style first-max tie-breaking (strict '>' while iterating forward).
    C = x_ref.shape[1]
    best_val = x_ref[:, 0, :]                                  # (TB, TL)
    best_idx = jnp.zeros(best_val.shape, dtype=jnp.int32)      # (TB, TL)
    for c in range(1, C):                                      # static unroll (C small)
        xc = x_ref[:, c, :]
        take = xc > best_val
        best_val = jnp.where(take, xc, best_val)
        best_idx = jnp.where(take, jnp.int32(c), best_idx)
    o_ref[...] = best_idx


def _round_up(a, b):
    return (a + b - 1) // b * b


def _vmem_capacity_bytes():
    """Physical VMEM per core (v5e/v6e: 128 MiB, v7x: 64 MiB), with fallback."""
    try:
        cap = getattr(pltpu.get_tpu_info(), "vmem_capacity_bytes", None)
        if cap:
            return int(cap)
    except Exception:
        pass
    return 64 * 1024 * 1024  # conservative (v7x per-TensorCore)


def _choose_tiles(N, C, L, in_bytes, budget):
    """Pick (TB, TL). The VMEM estimate includes double-buffering of in/out
    tiles, sublane padding of the C axis, lane/sublane padding of the output
    tile, and the (TB, TL)-sized running-argmax intermediates."""
    sub = max(8, 32 // max(1, in_bytes))      # sublane packing: f32=8, bf16=16, i8=32
    c_pad = _round_up(C, sub)

    def tile_bytes(tb, tl):
        tl_p = _round_up(tl, 128)
        tb_p = _round_up(tb, 8)
        in_tile = tb * c_pad * tl_p * in_bytes
        out_tile = tb_p * tl_p * 4
        scratch = 4 * tb_p * tl_p * 4         # best_val, best_idx, where temps
        return 2 * (in_tile + out_tile) + scratch

    # Lane (L) axis: multiples of 128 that do not exceed L (ragged tail handled
    # by a cdiv grid with masked stores); full extent if L < 128.
    if L < 128:
        tl_candidates = [L]
    else:
        max_tl = min((L // 128) * 128, 64 * 1024)
        tl_candidates = list(range(128, max_tl + 1, 128))

    # Batch (N) axis: multiples of 8 not exceeding N (sublane-dense output), or
    # full extent when N < 8.
    if N < 8:
        tb_candidates = [N]
    else:
        max_tb = min((N // 8) * 8, 1024)
        tb_candidates = list(range(8, max_tb + 1, 8))

    TL = tl_candidates[0]
    TB = tb_candidates[0]
    for tl in tl_candidates:                  # grow TL first (contiguous DMA rows)
        if tile_bytes(TB, tl) <= budget:
            TL = tl
    for tb in tb_candidates:                  # then grow TB (amortize per-step cost)
        if tile_bytes(tb, TL) <= budget:
            TB = tb
    return TB, TL


def _ensure_two_steps(N, L, TB, TL):
    """Keep >= 2 grid steps when possible so both v7x TensorCores get work."""
    if pl.cdiv(N, TB) * pl.cdiv(L, TL) >= 2:
        return TB, TL
    if L >= 256 and TL >= 256:
        TL = ((pl.cdiv(L, 128) + 1) // 2) * 128
    elif N >= 16 and TB >= 16:
        TB = _round_up((N + 1) // 2, 8)
    return TB, TL


def out_softmax1d(x):
    """x: (N, C, L) float array -> (N, L) int32 argmax-of-softmax over channels."""
    N, C, L = x.shape
    vmem_cap = _vmem_capacity_bytes()
    budget = vmem_cap // 4                     # headroom for pipeline bookkeeping
    TB, TL = _choose_tiles(N, C, L, x.dtype.itemsize, budget)
    TB, TL = _ensure_two_steps(N, L, TB, TL)
    grid = (pl.cdiv(N, TB), pl.cdiv(L, TL))

    return pl.pallas_call(
        _argmax_channels_kernel,
        out_shape=jax.ShapeDtypeStruct((N, L), jnp.int32),
        grid_spec=pltpu.PrefetchScalarGridSpec(
            num_scalar_prefetch=0,
            grid=grid,
            in_specs=[pl.BlockSpec((TB, C, TL), lambda b, l: (b, 0, l))],
            out_specs=pl.BlockSpec((TB, TL), lambda b, l: (b, l)),
        ),
        compiler_params=pltpu.CompilerParams(
            dimension_semantics=("parallel", "parallel"),
            vmem_limit_bytes=int(vmem_cap // 2),
        ),
    )(x)


def _reference(x):
    return jnp.argmax(jax.nn.softmax(x, axis=1), axis=1).astype(jnp.int32)


if __name__ == "__main__":
    key = jax.random.PRNGKey(0)
    k1, k2, k3 = jax.random.split(key, 3)

    # Small shape matching the 1D module: (batch, channels, length).
    x1 = jax.random.normal(k1, (2, 4, 16), dtype=jnp.float32)
    out1 = jax.block_until_ready(out_softmax1d(x1))
    assert out1.shape == (2, 16)
    assert bool(jnp.all(out1 == _reference(x1)))

    # Tiled path: TB=8, TL split to 128 to keep >= 2 grid steps.
    x2 = jax.random.normal(k2, (8, 5, 256), dtype=jnp.float32)
    out2 = jax.block_until_ready(out_softmax1d(x2))
    assert out2.shape == (8, 256)
    assert bool(jnp.all(out2 == _reference(x2)))

    # Ragged path: N % 8 != 0 and L % 128 != 0 (masked partial blocks on both axes).
    x3 = jax.random.normal(k3, (10, 3, 200), dtype=jnp.float32)
    out3 = jax.block_until_ready(out_softmax1d(x3))
    assert out3.shape == (10, 200)
    assert bool(jnp.all(out3 == _reference(x3)))

    print("KERNEL_OK")
</pallas_src>

<mosaic_0001>
module attributes {stable_mosaic.version = 11 : i64} {
  func.func @_argmax_channels_kernel(%arg0: i32, %arg1: i32, %arg2: memref<2x4x16xf32, #tpu.memory_space<vmem>>, %arg3: memref<2x16xi32, #tpu.memory_space<vmem>>) attributes {dimension_semantics = [#tpu.dimension_semantics<parallel>, #tpu.dimension_semantics<parallel>], iteration_bounds = array<i64: 1, 1>, scalar_prefetch = 0 : i64, scratch_operands = 0 : i64, tpu.core_type = #tpu.core_type<tc>, window_params = [{transform_indices = @transform_0, window_bounds = array<i64: 2, 4, 16>}, {transform_indices = @transform_1, window_bounds = array<i64: 2, 16>}]} {
    %c0 = arith.constant 0 : index
    %c0_0 = arith.constant 0 : index
    %c0_1 = arith.constant 0 : index
    %0 = vector.load %arg2[%c0, %c0_0, %c0_1] : memref<2x4x16xf32, #tpu.memory_space<vmem>>, vector<2x1x16xf32>
    %1 = vector.shape_cast %0 : vector<2x1x16xf32> to vector<2x16xf32>
    %c0_i32 = arith.constant 0 : i32
    %2 = vector.broadcast %c0_i32 : i32 to vector<2x16xi32>
    %c0_2 = arith.constant 0 : index
    %c1 = arith.constant 1 : index
    %c0_3 = arith.constant 0 : index
    %3 = vector.load %arg2[%c0_2, %c1, %c0_3] : memref<2x4x16xf32, #tpu.memory_space<vmem>>, vector<2x1x16xf32>
    %4 = vector.shape_cast %3 : vector<2x1x16xf32> to vector<2x16xf32>
    %5 = arith.cmpf ogt, %4, %1 : vector<2x16xf32>
    %6 = arith.select %5, %4, %1 : vector<2x16xi1>, vector<2x16xf32>
    %c1_i32 = arith.constant 1 : i32
    %7 = vector.broadcast %c1_i32 : i32 to vector<2x16xi32>
    %8 = arith.select %5, %7, %2 : vector<2x16xi1>, vector<2x16xi32>
    %c0_4 = arith.constant 0 : index
    %c2 = arith.constant 2 : index
    %c0_5 = arith.constant 0 : index
    %9 = vector.load %arg2[%c0_4, %c2, %c0_5] : memref<2x4x16xf32, #tpu.memory_space<vmem>>, vector<2x1x16xf32>
    %10 = vector.shape_cast %9 : vector<2x1x16xf32> to vector<2x16xf32>
    %11 = arith.cmpf ogt, %10, %6 : vector<2x16xf32>
    %12 = arith.select %11, %10, %6 : vector<2x16xi1>, vector<2x16xf32>
    %c2_i32 = arith.constant 2 : i32
    %13 = vector.broadcast %c2_i32 : i32 to vector<2x16xi32>
    %14 = arith.select %11, %13, %8 : vector<2x16xi1>, vector<2x16xi32>
    %c0_6 = arith.constant 0 : index
    %c3 = arith.constant 3 : index
    %c0_7 = arith.constant 0 : index
    %15 = vector.load %arg2[%c0_6, %c3, %c0_7] : memref<2x4x16xf32, #tpu.memory_space<vmem>>, vector<2x1x16xf32>
    %16 = vector.shape_cast %15 : vector<2x1x16xf32> to vector<2x16xf32>
    %17 = arith.cmpf ogt, %16, %12 : vector<2x16xf32>
    %c3_i32 = arith.constant 3 : i32
    %18 = vector.broadcast %c3_i32 : i32 to vector<2x16xi32>
    %19 = arith.select %17, %18, %14 : vector<2x16xi1>, vector<2x16xi32>
    %c0_8 = arith.constant 0 : index
    %c0_9 = arith.constant 0 : index
    %20 = vector.load %arg3[%c0_8, %c0_9] : memref<2x16xi32, #tpu.memory_space<vmem>>, vector<2x16xi32>
    tpu.vector_store %arg3[%c0_8, %c0_9], %19 {strides = array<i32>} : memref<2x16xi32, #tpu.memory_space<vmem>>, vector<2x16xi32>,
    return
  }
  func.func @transform_0(%arg0: i32, %arg1: i32) -> (i32, i32, i32) {
    %c0_i32 = arith.constant 0 : i32
    %c0_i32_0 = arith.constant 0 : i32
    return %arg0, %c0_i32, %arg1 : i32, i32, i32
  }
  func.func @transform_1(%arg0: i32, %arg1: i32) -> (i32, i32) {
    %c0_i32 = arith.constant 0 : i32
    return %arg0, %arg1 : i32, i32
  }
}

</mosaic_0001>

<bundles_post_ra>
// kernel: tpu_custom_call.1
= control target key start
LH: loop header
LB: loop body
LE: loop exit
PB: predicated region body
PF: predicated region fallthrough
CT: control target
= control target key end

     0   :  { %6 = vsyncpa [#allocation3], 0  ;;  %s137_s0 = inlined_call_operand.hbm [shape: f32[2,4,16], index: 0, kind: input, shape index: {}]   ;;  %s138_s1 = inlined_call_operand.hbm [shape: s32[2,16], index: 1, kind: output, shape index: {}]  }
   0x1   :  { %7 = vsyncpa [#allocation4], 0  ;;  %s116_s6 = smov [#allocation2]  }
   0x2   :  { %s13_s7 = sshll.u32 %s116_s6, 4  ;;  %s14_s7 = int_to_ptr.vmem [resolvable:$true] %s13_s7 }
   0x3   :  { %s80_s8 = scalar_lea.vmem %s14_s7, 128  ;;  %p85_p1 = scmp.lt.s32.totalorder %s14_s7, %s14_s7 }
   0x4   :  { %p81_p0 = scmp.ne.s32.totalorder %s14_s7, %s80_s8  ;;  %p86_p2 = scmp.lt.s32.totalorder %s80_s8, %s80_s8 }
   0x6   :  { %p87_p3 = por %p86_p2, %p85_p1 }
   0x8   :  { %p88_p4 = pnand %p87_p3, %p81_p0 }
   0xa   :  { %91 = shalt.err (!%p88_p4)
}
   0xb   :  { %s117_s9 = smov 64   ;;  %s118_s10 = smov 4  }
   0xc   :  { %19 = dma.hbm_to_vmem [thread:$0]  %s137_s0, 128, %s14_s7, [#allocation3], %s117_s9, %s117_s9, %s118_s10  }
   0xd   :  { %112 = dma.done.wait [#allocation3], 128  }
   0xe   :  { %113 = vsyncadd [#allocation3], 4294967168  ;;  %v23_v0 = vld [vmem:[#allocation2] sm:$0x1]  ;;  %v24_v1 = vld [vmem:[#allocation2 + $0x4] sm:$0x1] }
   0xf   :  { %v25_v2 = vld [vmem:[#allocation2 + $0x1] sm:$0x1]  ;;  %v26_v3 = vld [vmem:[#allocation2 + $0x5] sm:$0x1]  ;;  %v33_v4 = vld [vmem:[#allocation2 + $0x2] sm:$0x1] }
  0x10   :  { %vm27_vm0 = vcmp.gt.f32.partialorder %v25_v2, %v23_v0  ;;  %v34_v5 = vld [vmem:[#allocation2 + $0x6] sm:$0x1]  ;;  %vm28_vm1 = vcmp.gt.f32.partialorder %v26_v3, %v24_v1  ;;  %v119_v7 = vmov 0   ;;  %v41_v9 = vld [vmem:[#allocation2 + $0x3] sm:$0x1]  ;;  %s120_s0 = smov [#allocation5]  }
  0x11   :  { %v29_v6 = vsel %vm27_vm0, %v25_v2, %v23_v0  ;;  %v31_v8 = vsel %vm27_vm0, 1, %v119_v7  ;;  %v30_v10 = vsel %vm28_vm1, %v26_v3, %v24_v1  ;;  %v32_v11 = vsel %vm28_vm1, 1, %v119_v7  ;;  %v42_v12 = vld [vmem:[#allocation2 + $0x7] sm:$0x1]  ;;  %s58_s13 = sshll.u32 %s120_s0, 4  ;;  %s59_s13 = int_to_ptr.vmem [resolvable:$true] %s58_s13 }
  0x12   :  { %vm35_vm2 = vcmp.gt.f32.partialorder %v33_v4, %v29_v6  ;;  %vm36_vm3 = vcmp.gt.f32.partialorder %v34_v5, %v30_v10  ;;  %vm48_vm6 = vcmask 1041409   ;;  %vm50_vm7 = vcmask 123904   ;;  %s92_s14 = scalar_lea.vmem %s59_s13, 32  ;;  %p97_p6 = scmp.lt.s32.totalorder %s59_s13, %s59_s13 }
  0x13   :  { %v37_v13 = vsel %vm35_vm2, %v33_v4, %v29_v6  ;;  %v39_v14 = vsel %vm35_vm2, 2, %v31_v8  ;;  %v38_v15 = vsel %vm36_vm3, %v34_v5, %v30_v10  ;;  %v40_v16 = vsel %vm36_vm3, 2, %v32_v11  ;;  %p93_p5 = scmp.ne.s32.totalorder %s59_s13, %s92_s14  ;;  %p98_p7 = scmp.lt.s32.totalorder %s92_s14, %s92_s14 }
  0x14   :  { %vm43_vm4 = vcmp.gt.f32.partialorder %v41_v9, %v37_v13  ;;  %vm44_vm5 = vcmp.gt.f32.partialorder %v42_v12, %v38_v15 }
  0x15   :  { %v45_v17 = vsel %vm43_vm4, 3, %v39_v14  ;;  %v46_v18 = vsel %vm44_vm5, 3, %v40_v16  ;;  %p99_p8 = por %p98_p7, %p97_p6 }
  0x16   :  { %v47_v19 = vrot.slane %v46_v18, 7 }
  0x17   :  { %p100_p9 = pnand %p99_p8, %p93_p5 }
  0x18   :  { %v49_v20 = vsel %vm48_vm6, %v47_v19, %v45_v17 }
  0x19   :  { %51 = vst.msk [vmem:[#allocation5] sm:$0x3] %vm50_vm7, %v49_v20 }
  0x1a   :  { %103 = shalt.err (!%p100_p9)
}
  0x1b   :  { %61 = dma.vmem_to_hbm [thread:$0]  %s59_s13, 32, %s138_s1, [#allocation4]  }
  0x1c   :  { %114 = dma.done.wait [#allocation4], 32  }
  0x1d   :  { %115 = vsyncadd [#allocation4], 4294967264 }
  0x1e   :  { %65 = vsyncpa [#allocation3], 1 }
  0x1f   :  { %66 = vsyncpa [#allocation4], 1 }

</bundles_post_ra>
